<compile_context>
chip_gen: v6e
topology: v6e:2x2x1
jax: 0.10.0
libtpu: 0.0.40
codegen_flags: <defaults>
</compile_context>

<pallas_src>
import functools
import math

import jax
import jax.numpy as jnp
from jax import lax
from jax.experimental import pallas as pl
from jax.experimental.pallas import tpu as pltpu


def _cdiv(a, b):
    return (a + b - 1) // b


def _attn_core(q, k, v, wq, bq, wk, bk, mask, model_dim, out_dtype):
    bb, nq, qdim = q.shape
    nk = k.shape[1]
    mdim = wq.shape[0]

    # One flattened projection matmul per weight for the whole batch block.
    # Torch Linear layout [Mdim, Qdim] is contracted on its LAST dim so the
    # transpose is folded into the MXU (no wrapper / XLU transpose).
    dn = (((1,), (1,)), ((), ()))
    qp = lax.dot_general(q.reshape(bb * nq, qdim), wq, dn,
                         preferred_element_type=jnp.float32) + bq
    kp = lax.dot_general(k.reshape(bb * nk, qdim), wk, dn,
                         preferred_element_type=jnp.float32) + bk
    qp = qp.reshape(bb, nq, mdim)
    kp = kp.reshape(bb, nk, mdim)

    # Scaled per-instance scores [bb, Nq, Nk] (batched MXU contraction over
    # Mdim; kp^T folded into the contraction).
    scores = jnp.einsum('bqm,bkm->bqk', qp, kp,
                        preferred_element_type=jnp.float32)
    scores = scores * (1.0 / math.sqrt(model_dim))

    # masked_fill(Attn, mask, -(1 << 32)) -- replacement (not additive) so a
    # fully-masked row degrades to a uniform distribution like the reference.
    if mask is not None:
        scores = jnp.where(mask != 0, jnp.float32(-(1 << 32)), scores)

    # Numerically stable softmax over the key axis.
    m = jnp.max(scores, axis=-1, keepdims=True)
    e = jnp.exp(scores - m)
    denom = jnp.sum(e, axis=-1, keepdims=True)
    attn = e * pl.reciprocal(denom, approx=False)  # exact: 1e-4 tolerance

    out = jnp.einsum('bqk,bkv->bqv', attn, v,
                     preferred_element_type=jnp.float32)
    return out.astype(out_dtype)


def _attn_kernel_masked(q_ref, k_ref, v_ref, wq_ref, bq_ref, wk_ref, bk_ref,
                        mask_ref, o_ref, *, model_dim):
    o_ref[...] = _attn_core(q_ref[...], k_ref[...], v_ref[...],
                            wq_ref[...], bq_ref[...], wk_ref[...], bk_ref[...],
                            mask_ref[...], model_dim, o_ref.dtype)


def _attn_kernel_nomask(q_ref, k_ref, v_ref, wq_ref, bq_ref, wk_ref, bk_ref,
                        o_ref, *, model_dim):
    o_ref[...] = _attn_core(q_ref[...], k_ref[...], v_ref[...],
                            wq_ref[...], bq_ref[...], wk_ref[...], bk_ref[...],
                            None, model_dim, o_ref.dtype)


@jax.jit
def attention_agger_forward(Q, K, V, WQ_w, WQ_b, WK_w, WK_b, mask=None):
    """Pallas AttentionAgger.forward.

    Q: [Nq, Qdim] or [B, Nq, Qdim];  K: [Nk, Qdim] (+B);  V: [Nk, Vdim] (+B)
    WQ_w/WK_w: torch Linear layout [Mdim, Qdim];  WQ_b/WK_b: [Mdim]
    mask: optional [Nq, Nk] (+B), nonzero/True == masked.
    """
    squeeze = (Q.ndim == 2)
    if squeeze:
        Q, K, V = Q[None], K[None], V[None]
        if mask is not None:
            mask = mask[None]

    B, Nq, Qdim = Q.shape
    Nk = K.shape[1]
    Vdim = V.shape[-1]
    Mdim = WQ_w.shape[0]

    f32 = jnp.float32
    Qx = Q.astype(f32)
    Kx = K.astype(f32)
    Vx = V.astype(f32)
    wq = WQ_w.astype(f32)                       # torch layout, no transpose
    wk = WK_w.astype(f32)
    bq = WQ_b.astype(f32).reshape(1, Mdim)
    bk = WK_b.astype(f32).reshape(1, Mdim)

    # Batch blocking: >=2 grid steps when B>=2 so both TensorCores on
    # dual-core chips (v7x) get work; everything within a step shares one
    # projection matmul.  Pad the batch dim with zero instances if needed
    # (their outputs are zero and sliced off below).
    num_steps = 2 if B >= 2 else 1
    b_blk = _cdiv(B, num_steps)
    Bp = num_steps * b_blk
    if Bp != B:
        pad3 = ((0, Bp - B), (0, 0), (0, 0))
        Qx = jnp.pad(Qx, pad3)
        Kx = jnp.pad(Kx, pad3)
        Vx = jnp.pad(Vx, pad3)
        if mask is not None:
            mask = jnp.pad(mask, pad3)          # padded rows stay unmasked

    mask_f = None if mask is None else mask.astype(f32)

    # Full-extent block dims on every trailing axis (Nq/Nk/Qdim/Mdim/Vdim)
    # satisfy the (8,128)-or-full-dim rule with no lane padding; Mosaic pads
    # sub-128 lanes in-vreg for free.
    q_spec = pl.BlockSpec((b_blk, Nq, Qdim), lambda b: (b, 0, 0))
    k_spec = pl.BlockSpec((b_blk, Nk, Qdim), lambda b: (b, 0, 0))
    v_spec = pl.BlockSpec((b_blk, Nk, Vdim), lambda b: (b, 0, 0))
    w_spec = pl.BlockSpec((Mdim, Qdim), lambda b: (0, 0))   # resident weights
    bias_spec = pl.BlockSpec((1, Mdim), lambda b: (0, 0))
    o_spec = pl.BlockSpec((b_blk, Nq, Vdim), lambda b: (b, 0, 0))

    inputs = [Qx, Kx, Vx, wq, bq, wk, bk]
    in_specs = [q_spec, k_spec, v_spec, w_spec, bias_spec, w_spec, bias_spec]

    if mask_f is not None:
        inputs.append(mask_f)
        in_specs.append(pl.BlockSpec((b_blk, Nq, Nk), lambda b: (b, 0, 0)))
        kernel_fn = functools.partial(_attn_kernel_masked, model_dim=Mdim)
    else:
        kernel_fn = functools.partial(_attn_kernel_nomask, model_dim=Mdim)

    # Advisory cost: weights/biases counted once (constant index_map keeps
    # them resident); flops/bytes use unpadded dims.
    flops = 2 * Bp * (Nq * Qdim * Mdim + Nk * Qdim * Mdim
                      + Nq * Nk * Mdim + Nq * Nk * Vdim)
    transcendentals = Bp * Nq * Nk  # exp
    bytes_accessed = 4 * (Bp * (Nq * Qdim + Nk * Qdim + Nk * Vdim + Nq * Vdim)
                          + 2 * Mdim * Qdim + 2 * Mdim)
    if mask_f is not None:
        bytes_accessed += 4 * Bp * Nq * Nk
    cost = pl.CostEstimate(flops=flops, transcendentals=transcendentals,
                           bytes_accessed=bytes_accessed)

    out = pl.pallas_call(
        kernel_fn,
        out_shape=jax.ShapeDtypeStruct((Bp, Nq, Vdim), f32),
        grid=(num_steps,),
        in_specs=in_specs,
        out_specs=o_spec,
        compiler_params=pltpu.CompilerParams(
            dimension_semantics=("parallel",),
            allow_input_fusion=[True] * len(inputs)),
        cost_estimate=cost,
    )(*inputs)

    out = out[:B]
    if squeeze:
        out = out[0]
    return out


def _reference_forward(Q, K, V, WQ_w, WQ_b, WK_w, WK_b, mask=None):
    Mdim = WQ_w.shape[0]
    Qp = Q @ WQ_w.T + WQ_b
    Kp = K @ WK_w.T + WK_b
    attn = jnp.einsum('...qm,...km->...qk', Qp, Kp) / math.sqrt(Mdim)
    if mask is not None:
        attn = jnp.where(mask, jnp.float32(-(1 << 32)), attn)
    attn = jax.nn.softmax(attn, axis=-1)
    return jnp.einsum('...qk,...kv->...qv', attn, V)


if __name__ == "__main__":
    # Small shapes consistent with the module; B independent instances are
    # batched through the parallel grid axis (B_BLK per step).
    B, Nq, Nk = 4, 8, 16
    Qdim, Mdim, Vdim = 32, 32, 24

    key = jax.random.PRNGKey(0)
    kq, kk, kv, kwq, kbq, kwk, kbk, kmask = jax.random.split(key, 8)

    Q = jax.random.normal(kq, (B, Nq, Qdim), dtype=jnp.float32)
    K = jax.random.normal(kk, (B, Nk, Qdim), dtype=jnp.float32)
    V = jax.random.normal(kv, (B, Nk, Vdim), dtype=jnp.float32)

    # torch Linear layout: [out_features, in_features]
    bound = 1.0 / math.sqrt(Qdim)
    WQ_w = jax.random.uniform(kwq, (Mdim, Qdim), jnp.float32, -bound, bound)
    WQ_b = jax.random.uniform(kbq, (Mdim,), jnp.float32, -bound, bound)
    WK_w = jax.random.uniform(kwk, (Mdim, Qdim), jnp.float32, -bound, bound)
    WK_b = jax.random.uniform(kbk, (Mdim,), jnp.float32, -bound, bound)

    mask = jax.random.bernoulli(kmask, 0.2, (B, Nq, Nk))

    # Batched + masked path (2 grid steps x 2 instances).
    out = attention_agger_forward(Q, K, V, WQ_w, WQ_b, WK_w, WK_b, mask=mask)
    out = jax.block_until_ready(out)
    ref = _reference_forward(Q, K, V, WQ_w, WQ_b, WK_w, WK_b, mask=mask)
    assert out.shape == (B, Nq, Vdim)
    assert jnp.allclose(out, ref, atol=1e-4, rtol=1e-4), (
        f"max abs err {jnp.max(jnp.abs(out - ref))}")

    # Odd batch (exercises the zero-padded batch instance path).
    out3 = attention_agger_forward(Q[:3], K[:3], V[:3], WQ_w, WQ_b, WK_w, WK_b,
                                   mask=mask[:3])
    out3 = jax.block_until_ready(out3)
    ref3 = _reference_forward(Q[:3], K[:3], V[:3], WQ_w, WQ_b, WK_w, WK_b,
                              mask=mask[:3])
    assert out3.shape == (3, Nq, Vdim)
    assert jnp.allclose(out3, ref3, atol=1e-4, rtol=1e-4), (
        f"max abs err {jnp.max(jnp.abs(out3 - ref3))}")

    # Module-faithful 2D call, no mask (exercises the mask-free kernel,
    # single grid step).
    out2 = attention_agger_forward(Q[0], K[0], V[0], WQ_w, WQ_b, WK_w, WK_b)
    out2 = jax.block_until_ready(out2)
    ref2 = _reference_forward(Q[0], K[0], V[0], WQ_w, WQ_b, WK_w, WK_b)
    assert out2.shape == (Nq, Vdim)
    assert jnp.allclose(out2, ref2, atol=1e-4, rtol=1e-4), (
        f"max abs err {jnp.max(jnp.abs(out2 - ref2))}")

    # TODO(synk): fc_out / get_emb head not exercised by forward(); omitted.
    print("KERNEL_OK")
</pallas_src>

<mosaic_0001>
module attributes {stable_mosaic.version = 11 : i64} {
  func.func @_attn_kernel_masked(%arg0: i32, %arg1: memref<2x8x32xf32, #tpu.memory_space<vmem>>, %arg2: memref<2x16x32xf32, #tpu.memory_space<vmem>>, %arg3: memref<2x16x24xf32, #tpu.memory_space<vmem>>, %arg4: memref<32x32xf32, #tpu.memory_space<vmem>>, %arg5: memref<1x32xf32, #tpu.memory_space<vmem>>, %arg6: memref<32x32xf32, #tpu.memory_space<vmem>>, %arg7: memref<1x32xf32, #tpu.memory_space<vmem>>, %arg8: memref<2x8x16xf32, #tpu.memory_space<vmem>>, %arg9: memref<2x8x24xf32, #tpu.memory_space<vmem>>) attributes {dimension_semantics = [#tpu.dimension_semantics<parallel>], iteration_bounds = array<i64: 2>, scalar_prefetch = 0 : i64, scratch_operands = 0 : i64, tpu.core_type = #tpu.core_type<tc>, window_params = [{transform_indices = @transform_0, window_bounds = array<i64: 2, 8, 32>}, {transform_indices = @transform_1, window_bounds = array<i64: 2, 16, 32>}, {transform_indices = @transform_2, window_bounds = array<i64: 2, 16, 24>}, {pipeline_mode = #tpu.pipeline_mode<synchronous>, transform_indices = @transform_3, window_bounds = array<i64: 32, 32>}, {pipeline_mode = #tpu.pipeline_mode<synchronous>, transform_indices = @transform_4, window_bounds = array<i64: 1, 32>}, {pipeline_mode = #tpu.pipeline_mode<synchronous>, transform_indices = @transform_5, window_bounds = array<i64: 32, 32>}, {pipeline_mode = #tpu.pipeline_mode<synchronous>, transform_indices = @transform_6, window_bounds = array<i64: 1, 32>}, {transform_indices = @transform_7, window_bounds = array<i64: 2, 8, 16>}, {transform_indices = @transform_8, window_bounds = array<i64: 2, 8, 24>}]} {
    %c0 = arith.constant 0 : index
    %c0_0 = arith.constant 0 : index
    %c0_1 = arith.constant 0 : index
    %0 = vector.load %arg1[%c0, %c0_0, %c0_1] : memref<2x8x32xf32, #tpu.memory_space<vmem>>, vector<2x8x32xf32>
    %c0_2 = arith.constant 0 : index
    %c0_3 = arith.constant 0 : index
    %c0_4 = arith.constant 0 : index
    %1 = vector.load %arg2[%c0_2, %c0_3, %c0_4] : memref<2x16x32xf32, #tpu.memory_space<vmem>>, vector<2x16x32xf32>
    %c0_5 = arith.constant 0 : index
    %c0_6 = arith.constant 0 : index
    %c0_7 = arith.constant 0 : index
    %2 = vector.load %arg3[%c0_5, %c0_6, %c0_7] : memref<2x16x24xf32, #tpu.memory_space<vmem>>, vector<2x16x24xf32>
    %c0_8 = arith.constant 0 : index
    %c0_9 = arith.constant 0 : index
    %3 = vector.load %arg4[%c0_8, %c0_9] : memref<32x32xf32, #tpu.memory_space<vmem>>, vector<32x32xf32>
    %c0_10 = arith.constant 0 : index
    %c0_11 = arith.constant 0 : index
    %4 = vector.load %arg5[%c0_10, %c0_11] : memref<1x32xf32, #tpu.memory_space<vmem>>, vector<1x32xf32>
    %c0_12 = arith.constant 0 : index
    %c0_13 = arith.constant 0 : index
    %5 = vector.load %arg6[%c0_12, %c0_13] : memref<32x32xf32, #tpu.memory_space<vmem>>, vector<32x32xf32>
    %c0_14 = arith.constant 0 : index
    %c0_15 = arith.constant 0 : index
    %6 = vector.load %arg7[%c0_14, %c0_15] : memref<1x32xf32, #tpu.memory_space<vmem>>, vector<1x32xf32>
    %c0_16 = arith.constant 0 : index
    %c0_17 = arith.constant 0 : index
    %c0_18 = arith.constant 0 : index
    %7 = vector.load %arg8[%c0_16, %c0_17, %c0_18] : memref<2x8x16xf32, #tpu.memory_space<vmem>>, vector<2x8x16xf32>
    %8 = vector.shape_cast %0 : vector<2x8x32xf32> to vector<16x32xf32>
    %cst = arith.constant dense<0.000000e+00> : vector<16x32xf32>
    %9 = tpu.matmul %8, %3, %cst {dimension_numbers = #tpu.dot_dimension_numbers<[1], [1], [0], [0], [0, 0, 1, 0], [], []>} : vector<16x32xf32>, vector<32x32xf32>, vector<16x32xf32> -> vector<16x32xf32>
    %10 = vector.broadcast %4 : vector<1x32xf32> to vector<16x32xf32>
    %11 = arith.addf %9, %10 : vector<16x32xf32>
    %12 = vector.shape_cast %1 : vector<2x16x32xf32> to vector<32x32xf32>
    %cst_19 = arith.constant dense<0.000000e+00> : vector<32x32xf32>
    %13 = tpu.matmul %12, %5, %cst_19 {dimension_numbers = #tpu.dot_dimension_numbers<[1], [1], [0], [0], [0, 0, 1, 0], [], []>} : vector<32x32xf32>, vector<32x32xf32>, vector<32x32xf32> -> vector<32x32xf32>
    %14 = vector.broadcast %6 : vector<1x32xf32> to vector<32x32xf32>
    %15 = arith.addf %13, %14 : vector<32x32xf32>
    %16 = vector.shape_cast %11 : vector<16x32xf32> to vector<2x8x32xf32>
    %17 = vector.shape_cast %15 : vector<32x32xf32> to vector<2x16x32xf32>
    "tpu.trace_start"() <{level = 10 : i32, message = "bqm,bkm->bqk"}> : () -> ()
    %cst_20 = arith.constant dense<0.000000e+00> : vector<2x8x16xf32>
    %18 = tpu.matmul %16, %17, %cst_20 {dimension_numbers = #tpu.dot_dimension_numbers<[2], [2], [1], [1], [0, 0, 0, 1, 1, 1], [0], [0]>} : vector<2x8x32xf32>, vector<2x16x32xf32>, vector<2x8x16xf32> -> vector<2x8x16xf32>
    "tpu.trace_stop"() : () -> ()
    %cst_21 = arith.constant 0.176776692 : f32
    %19 = vector.broadcast %cst_21 : f32 to vector<2x8x16xf32>
    %20 = arith.mulf %18, %19 : vector<2x8x16xf32>
    %cst_22 = arith.constant 0.000000e+00 : f32
    %21 = vector.broadcast %cst_22 : f32 to vector<2x8x16xf32>
    %22 = arith.cmpf one, %7, %21 : vector<2x8x16xf32>
    %cst_23 = arith.constant -4.2949673E+9 : f32
    %23 = vector.broadcast %cst_23 : f32 to vector<2x8x16xf32>
    %24 = arith.select %22, %23, %20 : vector<2x8x16xi1>, vector<2x8x16xf32>
    %cst_24 = arith.constant dense<0xFF800000> : vector<2x8xf32>
    %25 = vector.multi_reduction <maximumf>, %24, %cst_24 [2] : vector<2x8x16xf32> to vector<2x8xf32>
    %26 = vector.shape_cast %25 : vector<2x8xf32> to vector<2x8x1xf32>
    %27 = vector.broadcast %26 : vector<2x8x1xf32> to vector<2x8x16xf32>
    %28 = arith.subf %24, %27 : vector<2x8x16xf32>
    %29 = math.exp %28 : vector<2x8x16xf32>
    %cst_25 = arith.constant dense<0.000000e+00> : vector<2x8xf32>
    %30 = vector.multi_reduction <add>, %29, %cst_25 [2] : vector<2x8x16xf32> to vector<2x8xf32>
    %31 = vector.shape_cast %30 : vector<2x8xf32> to vector<2x8x1xf32>
    %32 = tpu.reciprocal %31 : vector<2x8x1xf32> -> vector<2x8x1xf32>
    %33 = vector.broadcast %32 : vector<2x8x1xf32> to vector<2x8x16xf32>
    %34 = arith.mulf %29, %33 : vector<2x8x16xf32>
    "tpu.trace_start"() <{level = 10 : i32, message = "bqk,bkv->bqv"}> : () -> ()
    %cst_26 = arith.constant dense<0.000000e+00> : vector<2x8x24xf32>
    %35 = tpu.matmul %34, %2, %cst_26 {dimension_numbers = #tpu.dot_dimension_numbers<[2], [1], [1], [2], [0, 0, 0, 1, 1, 2], [0], [0]>} : vector<2x8x16xf32>, vector<2x16x24xf32>, vector<2x8x24xf32> -> vector<2x8x24xf32>
    "tpu.trace_stop"() : () -> ()
    %c0_27 = arith.constant 0 : index
    %c0_28 = arith.constant 0 : index
    %c0_29 = arith.constant 0 : index
    %36 = vector.load %arg9[%c0_27, %c0_28, %c0_29] : memref<2x8x24xf32, #tpu.memory_space<vmem>>, vector<2x8x24xf32>
    tpu.vector_store %arg9[%c0_27, %c0_28, %c0_29], %35 {strides = array<i32>} : memref<2x8x24xf32, #tpu.memory_space<vmem>>, vector<2x8x24xf32>,
    return
  }
  func.func @transform_0(%arg0: i32) -> (i32, i32, i32) {
    %c0_i32 = arith.constant 0 : i32
    %c0_i32_0 = arith.constant 0 : i32
    %c0_i32_1 = arith.constant 0 : i32
    return %arg0, %c0_i32, %c0_i32_0 : i32, i32, i32
  }
  func.func @transform_1(%arg0: i32) -> (i32, i32, i32) {
    %c0_i32 = arith.constant 0 : i32
    %c0_i32_0 = arith.constant 0 : i32
    %c0_i32_1 = arith.constant 0 : i32
    return %arg0, %c0_i32, %c0_i32_0 : i32, i32, i32
  }
  func.func @transform_2(%arg0: i32) -> (i32, i32, i32) {
    %c0_i32 = arith.constant 0 : i32
    %c0_i32_0 = arith.constant 0 : i32
    %c0_i32_1 = arith.constant 0 : i32
    return %arg0, %c0_i32, %c0_i32_0 : i32, i32, i32
  }
  func.func @transform_3(%arg0: i32) -> (i32, i32) {
    %c0_i32 = arith.constant 0 : i32
    %c0_i32_0 = arith.constant 0 : i32
    %c0_i32_1 = arith.constant 0 : i32
    return %c0_i32, %c0_i32_0 : i32, i32
  }
  func.func @transform_4(%arg0: i32) -> (i32, i32) {
    %c0_i32 = arith.constant 0 : i32
    %c0_i32_0 = arith.constant 0 : i32
    %c0_i32_1 = arith.constant 0 : i32
    return %c0_i32, %c0_i32_0 : i32, i32
  }
  func.func @transform_5(%arg0: i32) -> (i32, i32) {
    %c0_i32 = arith.constant 0 : i32
    %c0_i32_0 = arith.constant 0 : i32
    %c0_i32_1 = arith.constant 0 : i32
    return %c0_i32, %c0_i32_0 : i32, i32
  }
  func.func @transform_6(%arg0: i32) -> (i32, i32) {
    %c0_i32 = arith.constant 0 : i32
    %c0_i32_0 = arith.constant 0 : i32
    %c0_i32_1 = arith.constant 0 : i32
    return %c0_i32, %c0_i32_0 : i32, i32
  }
  func.func @transform_7(%arg0: i32) -> (i32, i32, i32) {
    %c0_i32 = arith.constant 0 : i32
    %c0_i32_0 = arith.constant 0 : i32
    %c0_i32_1 = arith.constant 0 : i32
    return %arg0, %c0_i32, %c0_i32_0 : i32, i32, i32
  }
  func.func @transform_8(%arg0: i32) -> (i32, i32, i32) {
    %c0_i32 = arith.constant 0 : i32
    %c0_i32_0 = arith.constant 0 : i32
    %c0_i32_1 = arith.constant 0 : i32
    return %arg0, %c0_i32, %c0_i32_0 : i32, i32, i32
  }
}

</mosaic_0001>

<bundles_post_ra>
// kernel: attention_agger_forward.2
= control target key start
LH: loop header
LB: loop body
LE: loop exit
PB: predicated region body
PF: predicated region fallthrough
CT: control target
= control target key end

     0   :  { %s2101_s0 = inlined_call_operand.hbm [shape: f32[4,8,32], index: 0, kind: input, shape index: {}]   ;;  %s2102_s1 = inlined_call_operand.hbm [shape: f32[4,16,32], index: 1, kind: input, shape index: {}]   ;;  %s2103_s2 = inlined_call_operand.hbm [shape: f32[4,16,24], index: 2, kind: input, shape index: {}]   ;;  %s2104_s3 = inlined_call_operand.hbm [shape: f32[32,32], index: 3, kind: input, shape index: {}]   ;;  %s2105_s4 = inlined_call_operand.hbm [shape: f32[32,32], index: 4, kind: input, shape index: {}]   ;;  %s2106_s5 = inlined_call_operand.vmem [shape: pred[4,8,16], index: 5, kind: input, shape index: {}]   ;;  %s2107_s6 = inlined_call_operand.vmem [shape: f32[32], index: 6, kind: input, shape index: {}]   ;;  %s2108_s7 = inlined_call_operand.vmem [shape: f32[32], index: 7, kind: input, shape index: {}]   ;;  %s2109_s8 = inlined_call_operand.hbm [shape: f32[4,8,24], index: 8, kind: output, shape index: {}]  }
   0x1   :  { %2131 = sst [smem:[#allocation25_spill]] %s2102_s1 }
   0x2   :  { %2132 = sst [smem:[#allocation26_spill]] %s2104_s3 }
   0x3   :  { %2133 = sst [smem:[#allocation27_spill]] %s2109_s8 }
   0x4   :  { %13 = vsyncpa [#allocation3], 0 }
   0x5   :  { %15 = vsyncpa [#allocation3 + $0x1], 0 }
   0x6   :  { %16 = vsyncpa [#allocation6], 0 }
   0x7   :  { %18 = vsyncpa [#allocation6 + $0x1], 0 }
   0x8   :  { %19 = vsyncpa [#allocation9], 0 }
   0x9   :  { %20 = vsyncpa [#allocation4], 0 }
   0xa   :  { %22 = vsyncpa [#allocation4 + $0x1], 0  ;;  %s1728_s27 = smov 0   ;;  %s1730_s28 = smov 0  }
   0xb   :  { %s1732_s29 = smov 0   ;;  %s1734_s30 = smov 0  }
   0xc LB: > { %2134 = sst [smem:[#allocation19_spill]] %s1657_s27  ;;  %s1749_s9 = sadd.s32 4294967295, %s1669_s30   ;;  %s1669_s30 = sphi %s1734_s30, %s2167_s30   ;;  %s1665_s29 = sphi %s1732_s29, %s2169_s29   ;;  %s1661_s28 = sphi %s1730_s28, %s2171_s28   ;;  %s1657_s27 = sphi %s1728_s27, %s2170_s27  }
   0xd   : > { %2135 = sst [smem:[#allocation20_spill]] %s1665_s29  ;;  %s1226_s10 = sadd.s32 4294967294, %s1669_s30  }
   0xe   : > { %s1753_s11 = sadd.s32 1, %s1669_s30   ;;  %s35_s12 = sadd.s32 1, %s1665_s29 }
   0xf   : > { %2136 = sst [smem:[#allocation21_spill]] %s1753_s11  ;;  %s32_s13 = ssub.s32 %s1669_s30, %s1753_s11 }
  0x10   : > { %p42_p0 = scmp.ne.s32.totalorder %s1665_s29, %s1661_s28  ;;  %p33_p1 = scmp.eq.s32.totalorder %s32_s13, 0 }
  0x11   : > { %p43_p2 = scmp.eq.s32.totalorder %s1669_s30, 0  ;;  %p48_p3 = scmp.ne.s32.totalorder %s1661_s28, %s1657_s27 }
  0x12   : > { %p2110_p4 = scmp.eq.s32.totalorder %s1749_s9, 0  ;;  %p234_p7 = scmp.eq.s32.totalorder %s1749_s9, 1 }
  0x13   : > { %s1765_s14 = scalar_select %p33_p1, %s1665_s29, %s35_s12  }
  0x14   : > { %p1767_p5 = por %p43_p2, %p42_p0  ;;  %p1773_p6 = por %p2110_p4, %p48_p3 }
  0x15   : > { %2137 = sst [smem:[#allocation22_spill]] %s1765_s14  ;;  %p240_p8 = scmp.eq.s32.totalorder %s1226_s10, 1 }
  0x16   : > { %s2139_s16 = scalar_select %p1773_p6, 1, 0 }
  0x17   : > { %p1227_p9 = scmp.ge.s32.totalorder %s1669_s30, 1  ;;  %p247_p10 = scmp.lt.s32.totalorder %s1669_s30, 3 }
  0x18   : > { %p1780_p11 = por %p234_p7, %p42_p0  ;;  %p1784_p12 = por %p240_p8, %p48_p3 }
  0x19   : > { %p1788_p13 = pnand %p1227_p9, %p247_p10  ;;  %s1671_s20 = smov [#allocation8]  }
  0x1a   : > { %s2140_s17 = scalar_select %p1780_p11, 1, 0 }
  0x1b   : > { %s2142_s18 = scalar_select %p1784_p12, 1, 0 }
  0x1c   : > { %2141 = sst [smem:[#allocation23_spill]] %s2140_s17  ;;  %p1386_p1 = pneg %p1788_p13 }
  0x1d   : > { %2143 = sst [smem:[#allocation24_spill]] %s2142_s18  ;;  %s259_s21 = sshll.u32 %s1671_s20, 4  ;;  %s260_s21 = int_to_ptr.vmem [resolvable:$true] %s259_s21 }
  0x1e   : > { %s2144_s19 = scalar_select %p1788_p13, 1, 0 }
  0x1f   : > { %p1796_p2 = pnand %p1386_p1, %p2110_p4  ;;  %p1409_p3 = scmp.lt.s32.totalorder %s1669_s30, 2 }
  0x20   : > { %s1803_s23 = sand.u32 1, %s1665_s29   ;;  %s313_s24 = sand.u32 1, %s1669_s30  }
  0x21   : > { %s2145_s22 = scalar_select %p1796_p2, 1, 0 }
  0x22   : > { %p2122_p7 = pneg %p1796_p2  ;;  %s1472_s25 = scalar_lea.vmem %s260_s21, 512 }
  0x23   : > { %p1473_p8 = scmp.ne.s32.totalorder %s260_s21, %s1472_s25  ;;  %p1480_p12 = scmp.lt.s32.totalorder %s260_s21, %s260_s21 }
  0x24   : > { %p1481_p1 = scmp.lt.s32.totalorder %s1472_s25, %s1472_s25 }
  0x25   : > { %p1475_p9 = pnand %p1473_p8, %p2122_p7 }
  0x26   : > { %p1482_p4 = por %p1481_p1, %p1480_p12 }
  0x27   : > { %p1476_p10 = pneg %p1475_p9 }
  0x29   : > { %p1483_p11 = pnand %p1482_p4, %p1476_p10 }
  0x2b   : > { %1486 = shalt.err (!%p1483_p11)
}
  0x2c   : > { %s2116_s26 = smov 128   ;;  %s2120_s10 = smov 8  }
  0x2d   : > { %s2146_s3 = sld [smem:[#allocation26_spill]]  ;;  %p1823_p4 = pnand %p1409_p3, %p1767_p5 }
  0x2e   : > { %s2118_s25 = sshll.u32 %s1803_s23, 5  ;;  %s2119_s14 = sshll.u32 %s1669_s30, 9 }
  0x2f   : > { %s2148_s1 = sld [smem:[#allocation25_spill]]  ;;  %s1840_s12 = scalar_lea.sflag [#allocation6], %s313_s24 }
  0x30   : > { %p1846_p11 = pneg %p1823_p4 }
  0x33   : > { %1389 = dma.hbm_to_vmem [thread:$0]  (!%p1796_p2), %s2146_s3, 512, %s260_s21, [#allocation9], %s2116_s26, %s2116_s26, %s2120_s10  }
  0x34   : > { %s317_s21 = scalar_lea.vmem [#allocation5], %s2118_s25 }
  0x35   : > { %s1834_s18 = scalar_lea.hbm %s2148_s1, %s2119_s14  ;;  %s325_s15 = sshll.u32 %s317_s21, 4  ;;  %s1838_s15 = int_to_ptr.vmem [resolvable:$true] %s325_s15 }
  0x36   : > { %s1487_s13 = scalar_lea.hbm %s1834_s18, 512  ;;  %s1492_s25 = scalar_lea.hbm %s2148_s1, 1024 }
  0x37   : > { %p1488_p5 = scmp.ne.s32.totalorder %s1834_s18, %s1487_s13  ;;  %p1493_p8 = scmp.lt.s32.totalorder %s1834_s18, %s2148_s1 }
  0x38   : > { %p1494_p9 = scmp.lt.s32.totalorder %s1492_s25, %s1487_s13 }
  0x39   : > { %p1490_p12 = pnand %p1846_p11, %p1488_p5 }
  0x3a   : > { %p1495_p10 = por %p1494_p9, %p1493_p8 }
  0x3b   : > { %p1491_p3 = pneg %p1490_p12 }
  0x3d   : > { %p1496_p1 = pnand %p1495_p10, %p1491_p3 }
  0x3f   : > { %1499 = shalt.err (!%p1496_p1)
}
  0x40   : > { %s1500_s24 = scalar_lea.vmem %s1838_s15, 512  ;;  %s1674_s10 = smov [#allocation5]  }
  0x41   : > { %p1501_p0 = scmp.ne.s32.totalorder %s1838_s15, %s1500_s24  ;;  %s1505_s29 = sshll.u32 %s1674_s10, 4  ;;  %s1506_s29 = int_to_ptr.vmem [resolvable:$false] %s1505_s29 }
  0x42   : > { %s1507_s11 = scalar_lea.vmem %s1506_s29, 1024  ;;  %p1508_p7 = scmp.lt.s32.totalorder %s1838_s15, %s1506_s29 }
  0x43   : > { %p1503_p5 = pnand %p1501_p0, %p1846_p11  ;;  %p1509_p6 = scmp.lt.s32.totalorder %s1507_s11, %s1500_s24 }
  0x45   : > { %p1504_p12 = pneg %p1503_p5  ;;  %p1510_p13 = por %p1509_p6, %p1508_p7 }
  0x47   : > { %p1511_p2 = pnand %p1510_p13, %p1504_p12 }
  0x49   : > { %1514 = shalt.err (!%p1511_p2)
}
  0x4a   : > { %s2150_s14 = smov 8   ;;  %s2151_s25 = smov 128  }
  0x4b   : > { %1399 = dma.hbm_to_vmem [thread:$0]  (!%p1823_p4), %s1834_s18, 512, %s1838_s15, %s1840_s12, %s2151_s25, %s2151_s25, %s2150_s14  }
  0x4c   : > { %s2152_s10 = sshll.u32 %s1669_s30, 9  ;;  %s2153_s29 = sshll.u32 %s1803_s23, 5 }
  0x4d   : > { %s1877_s24 = scalar_lea.hbm %s2103_s2, %s2152_s10  ;;  %s339_s11 = scalar_lea.vmem [#allocation7], %s2153_s29 }
  0x4e   : > { %s347_s1 = sshll.u32 %s339_s11, 4  ;;  %s1675_s3 = smov [#allocation10]   ;;  %s1881_s1 = int_to_ptr.vmem [resolvable:$true] %s347_s1 }
  0x4f   : > { %s275_s27 = sshll.u32 %s1675_s3, 4  ;;  %s1231_s8 = sshll.u32 %s1803_s23, 4  ;;  %s276_s27 = int_to_ptr.vmem [resolvable:$true] %s275_s27 }
  0x50   : > { %s1526_s17 = scalar_lea.vmem %s276_s27, 512  ;;  %p2154_p13 = scmp.ne.s32.totalorder %s2145_s22, 0 }
  0x51   : > { %p1527_p6 = scmp.ne.s32.totalorder %s276_s27, %s1526_s17  ;;  %p1534_p3 = scmp.lt.s32.totalorder %s276_s27, %s276_s27 }
  0x52   : > { %p2155_p2 = pneg %p2154_p13  ;;  %p1535_p8 = scmp.lt.s32.totalorder %s1526_s17, %s1526_s17 }
  0x54   : > { %p1529_p0 = pnand %p1527_p6, %p2155_p2  ;;  %p1536_p9 = por %p1535_p8, %p1534_p3 }
  0x56   : > { %p1530_p7 = pneg %p1529_p0 }
  0x58   : > { %p1537_p10 = pnand %p1536_p9, %p1530_p7 }
  0x5a   : > { %1540 = shalt.err (!%p1537_p10)
}
  0x5b   : > { %1392 = dma.hbm_to_vmem [thread:$0]  (!%p2154_p13), %s2105_s4, 512, %s276_s27, [#allocation9], %s2151_s25, %s2151_s25, %s2150_s14  }
  0x5c   : > { %s1281_s15 = sshll.u32 %s1669_s30, 8  ;;  %s296_s22 = scalar_lea.vmem [#allocation2], %s1231_s8 }
  0x5d   : > { %s1899_s17 = scalar_lea.hbm %s2101_s0, %s1281_s15  ;;  %s303_s21 = sshll.u32 %s296_s22, 4  ;;  %s1901_s21 = int_to_ptr.vmem [resolvable:$true] %s303_s21 }
  0x5e   : > { %s293_s29 = scalar_lea.sflag [#allocation3], %s1803_s23  ;;  %s1541_s11 = scalar_lea.hbm %s1899_s17, 256 }
  0x5f   : > { %p1542_p1 = scmp.ne.s32.totalorder %s1899_s17, %s1541_s11  ;;  %s1546_s3 = scalar_lea.hbm %s2101_s0, 512 }
  0x60   : > { %p1547_p6 = scmp.lt.s32.totalorder %s1899_s17, %s2101_s0  ;;  %p1548_p13 = scmp.lt.s32.totalorder %s1546_s3, %s1541_s11 }
  0x61   : > { %p1544_p5 = pnand %p1542_p1, %p1846_p11 }
  0x62   : > { %p1549_p2 = por %p1548_p13, %p1547_p6 }
  0x63   : > { %p1545_p12 = pneg %p1544_p5 }
  0x65   : > { %p1550_p0 = pnand %p1549_p2, %p1545_p12 }
  0x67   : > { %1553 = shalt.err (!%p1550_p0)
}
  0x68   : > { %s1554_s8 = scalar_lea.vmem %s1901_s21, 256  ;;  %s1676_s23 = smov [#allocation2]  }
  0x69   : > { %p1555_p7 = scmp.ne.s32.totalorder %s1901_s21, %s1554_s8  ;;  %s1559_s13 = sshll.u32 %s1676_s23, 4  ;;  %s1560_s13 = int_to_ptr.vmem [resolvable:$false] %s1559_s13 }
  0x6a   : > { %s1561_s22 = scalar_lea.vmem %s1560_s13, 512  ;;  %p1562_p9 = scmp.lt.s32.totalorder %s1901_s21, %s1560_s13 }
  0x6b   : > { %p1557_p3 = pnand %p1555_p7, %p1846_p11  ;;  %p1563_p10 = scmp.lt.s32.totalorder %s1561_s22, %s1554_s8 }
  0x6d   : > { %p1558_p8 = pneg %p1557_p3  ;;  %p1564_p1 = por %p1563_p10, %p1562_p9 }
  0x6f   : > { %p1565_p5 = pnand %p1564_p1, %p1558_p8 }
  0x71   : > { %1568 = shalt.err (!%p1565_p5)
}
  0x72   : > { %1396 = dma.hbm_to_vmem [thread:$0]  (!%p1823_p4), %s1899_s17, 256, %s1901_s21, %s293_s29, %s2151_s25, %s2151_s25, %s2150_s14  }
  0x73   : > { %s1569_s11 = scalar_lea.hbm %s1877_s24, 512  ;;  %s1574_s3 = scalar_lea.hbm %s2103_s2, 1024 }
  0x74   : > { %p1570_p12 = scmp.ne.s32.totalorder %s1877_s24, %s1569_s11  ;;  %p1575_p2 = scmp.lt.s32.totalorder %s1877_s24, %s2103_s2 }
  0x75   : > { %p1576_p0 = scmp.lt.s32.totalorder %s1574_s3, %s1569_s11 }
  0x76   : > { %p1572_p6 = pnand %p1570_p12, %p1846_p11 }
  0x77   : > { %p1577_p7 = por %p1576_p0, %p1575_p2 }
  0x78   : > { %p1573_p13 = pneg %p1572_p6 }
  0x7a   : > { %p1578_p3 = pnand %p1577_p7, %p1573_p13 }
  0x7c   : > { %1581 = shalt.err (!%p1578_p3)
}
  0x7d   : > { %s1582_s17 = scalar_lea.vmem %s1881_s1, 512  ;;  %s1677_s21 = smov [#allocation7]  }
  0x7e   : > { %p1583_p8 = scmp.ne.s32.totalorder %s1881_s1, %s1582_s17  ;;  %s1587_s29 = sshll.u32 %s1677_s21, 4  ;;  %s1588_s29 = int_to_ptr.vmem [resolvable:$false] %s1587_s29 }
  0x7f   : > { %s1589_s8 = scalar_lea.vmem %s1588_s29, 1024  ;;  %p1590_p1 = scmp.lt.s32.totalorder %s1881_s1, %s1588_s29 }
  0x80   : > { %p1585_p9 = pnand %p1583_p8, %p1846_p11  ;;  %p1591_p5 = scmp.lt.s32.totalorder %s1589_s8, %s1582_s17 }
  0x82   : > { %p1586_p10 = pneg %p1585_p9  ;;  %p1592_p12 = por %p1591_p5, %p1590_p1 }
  0x84   : > { %p1593_p6 = pnand %p1592_p12, %p1586_p10 }
  0x86   : > { %1596 = shalt.err (!%p1593_p6)
}
  0x87   : > { %1402 = dma.hbm_to_vmem [thread:$0]  (!%p1823_p4), %s1877_s24, 512, %s1881_s1, %s1840_s12, %s2151_s25, %s2151_s25, %s2150_s14  }
  0x88   : > { %p2156_p11 = scmp.ne.s32.totalorder %s2144_s19, 0 }
  0x8a   : > { %368 = sbr.rel (%p2156_p11) target bundleno = 1092 (0x444), region = 52 }
  0x8f   : > { %s1954_s26 = sand.u32 1, %s1661_s28   ;;  %p2157_p13 = scmp.ne.s32.totalorder %s2139_s16, 0 }
  0x90   : > { %s1243_s23 = sshll.u32 %s1954_s26, 4  ;;  %s371_s13 = scalar_lea.sflag [#allocation3], %s1954_s26 }
  0x91   : > { %s1960_s20 = scalar_lea.vmem [#allocation2], %s1243_s23 }
  0x92   : > { %1640 = dma.done.wait (%p2157_p13), %s371_s13, 256  }
  0x93   : > { %1642 = vsyncadd (%p2157_p13), %s371_s13, 4294967040  ;;  %s379_s1 = sand.u32 1, %s1749_s9   ;;  %s1244_s19 = sshll.u32 %s1954_s26, 5 }
  0x94   : > { %s380_s12 = scalar_lea.sflag [#allocation6], %s379_s1  ;;  %s1968_s14 = scalar_lea.vmem [#allocation5], %s1244_s19 }
  0x95   : > { %1644 = dma.done.wait (%p2157_p13), %s380_s12, 1024  }
  0x96   : > { %1646 = vsyncadd (%p2157_p13), %s380_s12, 4294966272  ;;  %s1974_s25 = scalar_lea.vmem [#allocation7], %s1244_s19  ;;  %p2158_p4 = scmp.eq.s32.totalorder %s1749_s9, 0 }
  0x98   : > { %1648 = dma.done.wait (%p2158_p4), [#allocation9], 1024   ;;  %p2159_p2 = pmov %p2158_p4 }
  0x99   : > { %vm520_vm0 = vcmask 261120   ;;  %v510_v0 = vld [vmem:[#allocation10 + $0x18] sm:$0xff]  ;;  %v509_v2 = vld [vmem:[#allocation10 + $0x10] sm:$0xff]  ;;  %v494_v4 = vld [vmem:[%s1968_s14] sm:$0xff]  ;;  %v1678_v16 = vmov 0.0   ;;  %vm1679_vm1 = vmmov 0  }
  0x9a   : > { %1650 = vsyncadd (%p2159_p2), [#allocation9], 4294966272  ;;  %v505_v1 = vld [vmem:[#allocation8 + $0x18] sm:$0xff]  ;;  %1328 = vmatprep.subr.msk.mxu1 %vm520_vm0, %v510_v0  ;;  %v504_v3 = vld [vmem:[#allocation8 + $0x10] sm:$0xff]  ;;  %1336 = vmatprep.mubr.msk.f32.mxu1 %vm520_vm0, %v494_v4  ;;  %s1249_s27 = sshll.u32 %s1749_s9, 1  ;;  %vm893_vm3 = vcmask 130048  }
  0x9b   : > { %1317 = vmatprep.subr.msk.mxu0 %vm520_vm0, %v505_v1  ;;  %1329 = vmatpush3.xpose.msk.msra.mxu1 %vm520_vm0, %v510_v0  ;;  %v492_v5 = vld [vmem:[%s1960_s20] sm:$0xff]  ;;  %v508_v6 = vld [vmem:[#allocation10 + $0x8] sm:$0xff]  ;;  %v497_v14 = vld [vmem:[%s1968_s14 + $0x18] sm:$0xff]  ;;  %p452_p0 = scmp.lt.s32.totalorder %s1249_s27, 3  ;;  %s2160_s17 = sld [smem:[#allocation23_spill]]  ;;  %vm1062_vm5 = vcmask 195584  }
  0x9c   : > { %1318 = vmatpush3.xpose.msk.msra.mxu0 %vm520_vm0, %v505_v1  ;;  %1330 = vmatprep.subr.msk.mxu1 %vm520_vm0, %v509_v2  ;;  %v503_v7 = vld [vmem:[#allocation8 + $0x8] sm:$0xff]  ;;  %v462_v8 = vld [vmem:[%s2107_s6] sm:$0x1]  ;;  %v496_v13 = vld [vmem:[%s1968_s14 + $0x10] sm:$0xff]  ;;  %s447_s21 = scalar_lea.vmem [#allocation11], %s1243_s23  ;;  %s1286_s8 = sshll.u32 %s1749_s9, 8 }
  0x9d   : > { %1319 = vmatprep.subr.msk.mxu0 %vm520_vm0, %v504_v3  ;;  %1325 = vmatprep.mubr.msk.f32.mxu0 %vm520_vm0, %v492_v5  ;;  %465 = vst [vmem:[#allocation13] sm:$0x1] %v462_v8  ;;  %v507_v9 = vld [vmem:[#allocation10] sm:$0xff]  ;;  %v495_v11 = vld [vmem:[%s1968_s14 + $0x8] sm:$0xff]  ;;  %s2173_s27 = smov (!%p452_p0, %s1249_s27), 3  ;;  %v501_v58 = vld [vmem:[%s1974_s25 + $0x18] sm:$0xff] }
  0x9e   : > { %v502_v10 = vld [vmem:[#allocation8] sm:$0xff]  ;;  %v493_v12 = vld [vmem:[%s1960_s20 + $0x8] sm:$0xff]  ;;  %s1250_s18 = sshll.u32 %s2173_s27, 1  ;;  %v500_v59 = vld [vmem:[%s1974_s25 + $0x10] sm:$0xff]  ;;  %s1079_s29 = sshll.u32 %s447_s21, 4  ;;  %s2053_s29 = int_to_ptr.vmem [resolvable:$true] %s1079_s29 }
  0x9f   : > { %1331 = vmatpush3.xpose.msk.msra.mxu1 %vm520_vm0, %v509_v2  ;;  %v458_v15 = vld [vmem:[%s2108_s7] sm:$0x1]  ;;  %s455_s15 = scalar_lea.vmem %s2106_s5, %s1250_s18  ;;  %v499_v56 = vld [vmem:[%s1974_s25 + $0x8] sm:$0xff]  ;;  %s2161_s1 = sld [smem:[#allocation27_spill]] }
  0xa0   : > { %1320 = vmatpush3.xpose.msk.msra.mxu0 %vm520_vm0, %v504_v3  ;;  %1332 = vmatprep.subr.msk.mxu1 %vm520_vm0, %v508_v6  ;;  %461 = vst [vmem:[#allocation12] sm:$0x1] %v458_v15  ;;  %v1288_v31 = vld [vmem:[%s455_s15] sm:$0xf]   ;;  %s1066_s12 = scalar_lea.sflag [#allocation4], %s1954_s26  ;;  %s1597_s23 = scalar_lea.vmem %s2053_s29, 256 }
  0xa1   : > { %1321 = vmatprep.subr.msk.mxu0 %vm520_vm0, %v503_v7  ;;  %v1289_v32 = vunpack.c.0.s8 %v1288_v31  ;;  %v1290_v34 = vunpack.c.1.s8 %v1288_v31  ;;  %v498_v57 = vld [vmem:[%s1974_s25] sm:$0xff]  ;;  %p1598_p7 = scmp.ne.s32.totalorder %s2053_s29, %s1597_s23  ;;  %p2162_p3 = scmp.ne.s32.totalorder %s2160_s17, 0 }
  0xa2   : > { %s1680_s9 = smov [#allocation11]  }
  0xa3   : > { %1333 = vmatpush3.xpose.msk.msra.mxu1 %vm520_vm0, %v508_v6  ;;  %v473_v33 = vcvt.s32.f32 %v1289_v32  ;;  %v486_v36 = vcvt.s32.f32 %v1290_v34  ;;  %p1599_p8 = pnand %p1598_p7, %p2162_p3  ;;  %s1601_s14 = sshll.u32 %s1680_s9, 4  ;;  %s1602_s14 = int_to_ptr.vmem [resolvable:$false] %s1601_s14 }
  0xa4   : > { %1322 = vmatpush3.xpose.msk.msra.mxu0 %vm520_vm0, %v503_v7  ;;  %1334 = vmatprep.subr.msk.mxu1 %vm520_vm0, %v507_v9  ;;  %v1259_v17 = vld [vmem:[#allocation13] ss:$0 sm:$0xff]  ;;  %s1603_s25 = scalar_lea.vmem %s1602_s14, 512  ;;  %p1604_p10 = scmp.lt.s32.totalorder %s2053_s29, %s1602_s14 }
  0xa5   : > { %1323 = vmatprep.subr.msk.mxu0 %vm520_vm0, %v502_v10  ;;  %vm889_vm2 = vcmp.ne.f32.partialorder %v473_v33, 0.0  ;;  %vm890_vm4 = vcmp.ne.f32.partialorder %v486_v36, 0.0  ;;  %s2058_s19 = scalar_lea.hbm %s2161_s1, %s1286_s8  ;;  %p1600_p9 = pneg %p1599_p8 }
  0xa6   : > { %p1605_p1 = scmp.lt.s32.totalorder %s1603_s25, %s1597_s23 }
  0xa7   : > { %1335 = vmatpush3.xpose.msk.msra.mxu1 %vm520_vm0, %v507_v9  ;;  %v1252_v24 = vld [vmem:[#allocation12] ss:$0 sm:$0xff] }
  0xa8   : > { %1324 = vmatpush3.xpose.msk.msra.mxu0 %vm520_vm0, %v502_v10  ;;  %1349 = vmatprep.subr.mxu1 %v1678_v16  ;;  %p1606_p5 = por %p1605_p1, %p1604_p10 }
  0xa9   : > { %1342 = vmatprep.subr.mxu0 %v1678_v16 }
  0xaa   : > { %1337 = vmatmul.mubr.msk.f32.vlgmr.msra.gmra.mxu1 %vm520_vm0, %v495_v11  ;;  %p1607_p12 = pnand %p1606_p5, %p1600_p9 }
  0xab   : > { %1326 = vmatmul.mubr.msk.f32.vlgmr.msra.gmra.mxu0 %vm520_vm0, %v493_v12  ;;  %1339 = vmatprep.mubr.msk.f32.mxu1 %vm520_vm0, %v496_v13 }
  0xac   : > { %1346 = vmatprep.mubr.msk.f32.mxu0 %vm1679_vm1, %v1678_v16 }
  0xae   : > { %1340 = vmatmul.mubr.msk.f32.gmra.mxu1 %vm520_vm0, %v497_v14 }
  0xaf   : > { %1353 = vmatprep.mubr.msk.f32.mxu1 %vm1679_vm1, %v1678_v16 }
 0x16a   : > { %v1338_v18 = vpop.f32.mrf.mxu1 }
 0x16b   : > { %v716_v19 = vadd.f32 %v1338_v18, %v1259_v17  ;;  %v1327_v20 = vpop.f32.mrf.mxu0 }
 0x16c   : > { %v710_v21 = vpop.f32.mrf.mxu1  ;;  %v611_v30 = vadd.f32 %v1327_v20, %v1252_v24 }
 0x16d   : > { %1343 = vmatpush3.xpose.msk.msra.mxu0 %vm520_vm0, %v716_v19  ;;  %v711_v23 = vadd.f32 %v1259_v17, %v710_v21  ;;  %v605_v26 = vpop.f32.mrf.mxu0 }
 0x16e   : > { %v1341_v22 = vpop.f32.mrf.mxu1  ;;  %1344 = vmatprep.subr.mxu0 %v1678_v16  ;;  %v606_v28 = vadd.f32 %v1252_v24, %v605_v26 }
 0x16f   : > { %v726_v25 = vadd.f32 %v1341_v22, %v1259_v17 }
 0x170   : > { %v720_v27 = vpop.f32.mrf.mxu1 }
 0x171   : > { %1345 = vmatpush3.xpose.msk.msra.mxu0 %vm520_vm0, %v711_v23  ;;  %1350 = vmatpush3.xpose.msk.msra.mxu1 %vm520_vm0, %v726_v25  ;;  %v721_v29 = vadd.f32 %v1259_v17, %v720_v27 }
 0x172   : > { %1351 = vmatprep.subr.mxu1 %v1678_v16  ;;  %1356 = vmatprep.subr.mxu0 %v1678_v16 }
 0x174   : > { %1347 = vmatmul.mubr.msk.f32.vlgmr.msra.gmra.mxu0 %vm520_vm0, %v606_v28 }
 0x175   : > { %1352 = vmatpush3.xpose.msk.msra.mxu1 %vm520_vm0, %v721_v29  ;;  %1360 = vmatprep.mubr.msk.f32.mxu0 %vm1679_vm1, %v1678_v16 }
 0x176   : > { %1363 = vmatprep.subr.mxu1 %v1678_v16  ;;  %1357 = vmatpush3.msra.mxu0 %v499_v56 }
 0x177   : > { %1358 = vmatprep.subr.mxu0 %v1678_v16 }
 0x178   : > { %1354 = vmatmul.mubr.msk.f32.vlgmr.msra.gmra.mxu1 %vm520_vm0, %v611_v30  ;;  %1359 = vmatpush3.msra.mxu0 %v498_v57 }
 0x179   : > { %1367 = vmatprep.mubr.msk.f32.mxu1 %vm1679_vm1, %v1678_v16  ;;  %1364 = vmatpush3.msra.mxu1 %v501_v58 }
 0x17a   : > { %1365 = vmatprep.subr.mxu1 %v1678_v16 }
 0x17b   : > { %1366 = vmatpush3.msra.mxu1 %v500_v59 }
 0x234   : > { %v804_v35 = vpop.f32.mrf.mxu0 }
 0x235   : > { %v887_v37 = vmul.f32 0.17677669, %v804_v35 }
 0x236   : > { %v1348_v38 = vpop.f32.mrf.mxu0 }
 0x237   : > { %v891_v39 = vsel %vm889_vm2, -4.2949673e+09, %v887_v37 }
 0x238   : > { %v883_v40 = vpop.f32.mrf.mxu1  ;;  %v894_v41 = vsel %vm893_vm3, %v891_v39, -inf }
 0x239   : > { %v888_v42 = vmul.f32 0.17677669, %v883_v40  ;;  %895 = vmax.xlane.f32.xlu0 %v894_v41 }
 0x23a   : > { %v1355_v43 = vpop.f32.mrf.mxu1 }
 0x23b   : > { %v892_v44 = vsel %vm890_vm4, -4.2949673e+09, %v888_v42 }
 0x23c   : > { %v897_v45 = vsel %vm893_vm3, %v892_v44, -inf }
 0x23d   : > { %898 = vmax.xlane.f32.xlu0 %v897_v45 }
 0x2c2   : > { %v896_v46 = vpop.xlane.xlu0 %895 }
 0x2c3   : > { %v900_v47 = vsub.f32 %v891_v39, %v896_v46 }
 0x2c5   : > { %v902_v48 = vmul.f32 1.442695, %v900_v47 }
 0x2c6   : > { %v899_v49 = vpop.xlane.xlu0 %898 }
 0x2c7   : > { %1453 = vpow2.f32 %v902_v48  ;;  %v901_v50 = vsub.f32 %v892_v44, %v899_v49 }
 0x2c9   : > { %v904_v51 = vmul.f32 1.442695, %v901_v50 }
 0x2cb   : > { %1455 = vpow2.f32 %v904_v51 }
 0x2d4   : > { %v1454_v52 = vpop.eup %1453 }
 0x2d5   : > { %v906_v53 = vsel %vm893_vm3, %v1454_v52, 0.0 }
 0x2d6   : > { %907 = vadd.xlane.f32.xlu1 %v906_v53 }
 0x2d8   : > { %v1456_v54 = vpop.eup %1455 }
 0x2d9   : > { %v909_v55 = vsel %vm893_vm3, %v1456_v54, 0.0 }
 0x2da   : > { %910 = vadd.xlane.f32.xlu1 %v909_v55 }
 0x35f   : > { %v908_v60 = vpop.xlane.xlu1 %907 }
 0x360   : > { %1457 = vrcp.f32 %v908_v60 }
 0x363   : > { %v911_v61 = vpop.xlane.xlu1 %910 }
 0x364   : > { %1459 = vrcp.f32 %v911_v61 }
 0x36d   : > { %v1458_v62 = vpop.eup %1457 }
 0x36e   : > { %v914_v63 = vmul.f32 %v1458_v62, %v1454_v52 }
 0x370   : > { %1361 = vmatmul.mubr.msk.f32.vlgmr.msra.gmra.mxu0 %vm893_vm3, %v914_v63 }
 0x371   : > { %v1460_v0 = vpop.eup %1459 }
 0x372   : > { %v915_v1 = vmul.f32 %v1460_v0, %v1456_v54 }
 0x374   : > { %1368 = vmatmul.mubr.msk.f32.vlgmr.msra.gmra.mxu1 %vm893_vm3, %v915_v1 }
 0x430   : > { %v985_v2 = vpop.f32.mrf.mxu0 }
 0x431   : > { %1063 = vst.msk [vmem:[%s447_s21] sm:$0xff] %vm1062_vm5, %v985_v2 }
 0x432   : > { %v1362_v3 = vpop.f32.mrf.mxu0 }
 0x434   : > { %v1058_v4 = vpop.f32.mrf.mxu1 }
 0x435   : > { %1064 = vst.msk [vmem:[%s447_s21 + $0x8] sm:$0xff] %vm1062_vm5, %v1058_v4 }
 0x436   : > { %v1369_v5 = vpop.f32.mrf.mxu1 }
 0x437   : > { %1610 = shalt.err (!%p1607_p12)
}
 0x438   : > { %s1611_s16 = scalar_lea.hbm %s2058_s19, 256  ;;  %s1615_s11 = scalar_lea.hbm %s2161_s1, 512 }
 0x439   : > { %p1612_p6 = scmp.ne.s32.totalorder %s2058_s19, %s1611_s16  ;;  %p1616_p4 = scmp.lt.s32.totalorder %s2058_s19, %s2161_s1 }
 0x43a   : > { %p1617_p2 = scmp.lt.s32.totalorder %s1615_s11, %s1611_s16 }
 0x43b   : > { %p1613_p11 = pnand %p1612_p6, %p2162_p3 }
 0x43c   : > { %p1618_p0 = por %p1617_p2, %p1616_p4 }
 0x43d   : > { %p1614_p13 = pneg %p1613_p11 }
 0x43f   : > { %p1619_p7 = pnand %p1618_p0, %p1614_p13 }
 0x441   : > { %1622 = shalt.err (!%p1619_p7)
}
 0x442   : > { %s1681_s3 = smov 128   ;;  %s1682_s10 = smov 8  }
 0x443   : > { %1384 = dma.vmem_to_hbm [thread:$0]  (%p2162_p3), %s2053_s29, 256, %s2058_s19, %s1066_s12, %s1681_s3, %s1681_s3, %s1682_s10  }
 0x444 PF: > { %s2163_s15 = sld [smem:[#allocation19_spill]]  ;;  %p2166_p9 = scmp.ge.s32.totalorder %s1669_s30, 2 }
 0x445   : > { %s2164_s21 = sld [smem:[#allocation24_spill]] }
 0x44a   : > { %s1094_s8 = sand.u32 1, %s2163_s15  }
 0x44b   : > { %p2165_p8 = scmp.ne.s32.totalorder %s2164_s21, 0  ;;  %s1095_s13 = scalar_lea.sflag [#allocation4], %s1094_s8 }
 0x44d   : > { %p1404_p10 = pnand %p2166_p9, %p2165_p8 }
 0x44f   : > { %p1405_p1 = pneg %p1404_p10 }
 0x451   : > { %1652 = dma.done.wait (%p1405_p1), %s1095_s13, 256  }
 0x452   : > { %1654 = vsyncadd (%p1405_p1), %s1095_s13, 4294967040  ;;  %s2167_s30 = sld [smem:[#allocation21_spill]]  ;;  %s2170_s27 = smov %s1661_s28 }
 0x453   : > { %s2168_s20 = sld [smem:[#allocation20_spill]] }
 0x454   : > { %s2169_s29 = sld [smem:[#allocation22_spill]] }
 0x458   : > { %p25_p5 = scmp.ge.s32.totalorder %s2167_s30, 4  }
 0x459   : > { %s2171_s28 = smov %s2168_s20 }
 0x45a   :  { %27 = sbr.rel (!%p25_p5) target bundleno = 12 (0xc), region = 134 }
 0x45f   :  { %1100 = vsyncpa [#allocation3], 1 }
 0x460   :  { %1102 = vsyncpa [#allocation3 + $0x1], 1 }
 0x461   :  { %1103 = vsyncpa [#allocation6], 1 }
 0x462   :  { %1105 = vsyncpa [#allocation6 + $0x1], 1 }
 0x463   :  { %1106 = vsyncpa [#allocation9], 1 }
 0x464   :  { %1107 = vsyncpa [#allocation4], 1 }
 0x465   :  { %1109 = vsyncpa [#allocation4 + $0x1], 1 }

</bundles_post_ra>
